<compile_context>
chip_gen: v7x
topology: tpu7x:2x2x1
jax: 0.10.0
libtpu: 0.0.40
codegen_flags: <defaults>
</compile_context>

<pallas_src>
import functools

import numpy as np
import jax
import jax.numpy as jnp
from jax.experimental import pallas as pl
from jax.experimental.pallas import tpu as pltpu


def _round_up(v, m):
    return (v + m - 1) // m * m


# ----------------------------------------------------------------------------
# Small path: whole (padded) batch lives in VMEM, single grid step, centered.
# ----------------------------------------------------------------------------
def _normal_reg_small_kernel(rw_ref, x_ref, o_ref, *, n, d):
    """rw_ref: (1,1) f32 in SMEM; x_ref: (Np,Dp) zero-padded f32 in VMEM;
    o_ref: (1,1) f32 in SMEM."""
    x = x_ref[...]                                   # (Np, Dp)
    np_rows, dp = x.shape

    # ---- column means (padded rows/cols are zero, so sums are exact) ----
    col_mean = jnp.sum(x, axis=0, keepdims=True) * (1.0 / n)           # (1, Dp)
    mean_term = jnp.sum(col_mean * col_mean, keepdims=True) * (1.0 / d)  # (1,1)

    # ---- center and fold 1/sqrt(n-1) so the Gram matrix IS the covariance ----
    inv_sqrt_nm1 = float((n - 1.0) ** -0.5)
    xm = (x - col_mean) * inv_sqrt_nm1
    if np_rows != n:  # padded rows would otherwise become -col_mean*scale
        rid = jax.lax.broadcasted_iota(jnp.int32, (np_rows, dp), 0)
        xm = jnp.where(rid < n, xm, 0.0)

    # C = xm^T @ xm  (already includes 1/(n-1)); padded rows/cols of C are 0.
    c = jax.lax.dot_general(xm, xm, (((0,), (0,)), ((), ())),
                            preferred_element_type=jnp.float32)        # (Dp,Dp)

    # mean((I - C)^2) = (||C||_F^2 - 2*tr(C) + d) / d^2 ; tr(C) = ||xm||_F^2
    tr_c = jnp.sum(xm * xm, keepdims=True)                             # (1,1)
    c_fro = jnp.sum(c * c, keepdims=True)                              # (1,1)
    cov_loss = (c_fro - 2.0 * tr_c + float(d)) * (1.0 / (d * d))       # (1,1)

    o_ref[0, 0] = jnp.sum(rw_ref[0, 0] * (mean_term + cov_loss))


# ----------------------------------------------------------------------------
# Tiled path: batch-reduction grid, VMEM usage independent of N.
# ----------------------------------------------------------------------------
def _normal_reg_tiled_kernel(rw_ref, x_ref, o_ref, s_ref, csum_ref, sq_ref,
                             *, n, d):
    """Accumulate S = X^T X, column sums and sum(x^2); finalize on last step."""
    step = pl.program_id(0)

    @pl.when(step == 0)
    def _():
        s_ref[...] = jnp.zeros_like(s_ref)
        csum_ref[...] = jnp.zeros_like(csum_ref)
        sq_ref[...] = jnp.zeros_like(sq_ref)

    x = x_ref[...]                                   # (Bn, Dp), zero padded
    csum_ref[...] += jnp.sum(x, axis=0, keepdims=True)
    sq_ref[...] += jnp.sum(x * x, keepdims=True)
    s_ref[...] += jax.lax.dot_general(x, x, (((0,), (0,)), ((), ())),
                                      preferred_element_type=jnp.float32)

    @pl.when(step == pl.num_programs(0) - 1)
    def _():
        dp = x.shape[1]
        fn = float(n)
        fact = 1.0 / (n - 1.0)

        mu = csum_ref[...] * (1.0 / n)                          # (1, Dp)
        mu_sq = jnp.sum(mu * mu, keepdims=True)                 # (1,1) ||mu||^2
        mean_term = mu_sq * (1.0 / d)

        s = s_ref[...]
        s_fro = jnp.sum(s * s, keepdims=True)                   # (1,1) ||S||_F^2

        # mu @ S @ mu^T via an 8-row broadcast matvec (tile-aligned MXU shapes).
        mu8 = pl.broadcast_to(mu, (8, dp))
        mu8_s = jax.lax.dot_general(mu8, s, (((1,), (0,)), ((), ())),
                                    preferred_element_type=jnp.float32)  # (8,Dp)
        mu_s_mu = jnp.sum(mu8_s * mu, keepdims=True) * 0.125    # (1,1)

        # C = (S - n*mu*mu^T)/(n-1) is never materialized:
        tr_c = (sq_ref[...] - fn * mu_sq) * fact                # (1,1)
        c_fro = (s_fro - 2.0 * fn * mu_s_mu
                 + (fn * fn) * (mu_sq * mu_sq)) * (fact * fact)  # (1,1)
        cov_loss = (c_fro - 2.0 * tr_c + float(d)) * (1.0 / (d * d))

        o_ref[0, 0] = jnp.sum(rw_ref[0, 0] * (mean_term + cov_loss))


# ----------------------------------------------------------------------------
# Wrapper
# ----------------------------------------------------------------------------
def normal_reg(x, reg_weight=1.0, *, block_rows=512):
    """Pallas implementation of NormalReg(regWeight).forward(x) for 2-D x."""
    x = jnp.asarray(x, jnp.float32)
    assert x.ndim == 2, "NormalReg expects a (batch, features) tensor"
    n, d = x.shape
    assert n >= 2, "cov() divides by (n - 1); need at least 2 samples"

    dp = max(_round_up(d, 128), 128)
    rw = jnp.full((1, 1), reg_weight, jnp.float32)   # SMEM scalar, no recompile

    smem_spec = pl.BlockSpec(memory_space=pltpu.MemorySpace.SMEM)
    out_shape = jax.ShapeDtypeStruct((1, 1), jnp.float32)

    if n <= block_rows:
        # ------------- gridless path: whole batch in one VMEM tile -------------
        np_rows = max(_round_up(n, 8), 8)
        if (np_rows, dp) != (n, d):               # skipped when already aligned
            x = jnp.pad(x, ((0, np_rows - n), (0, dp - d)))
        out = pl.pallas_call(
            functools.partial(_normal_reg_small_kernel, n=n, d=d),
            out_shape=out_shape,
            in_specs=[smem_spec,
                      pl.BlockSpec(memory_space=pltpu.MemorySpace.VMEM)],
            out_specs=smem_spec,
        )(rw, x)
    else:
        # ------------- batch-tiled reduction grid -------------
        np_rows = _round_up(n, block_rows)
        if (np_rows, dp) != (n, d):               # skipped when already aligned
            x = jnp.pad(x, ((0, np_rows - n), (0, dp - d)))
        out = pl.pallas_call(
            functools.partial(_normal_reg_tiled_kernel, n=n, d=d),
            out_shape=out_shape,
            grid=(np_rows // block_rows,),
            in_specs=[smem_spec,
                      pl.BlockSpec((block_rows, dp), lambda i: (i, 0))],
            out_specs=smem_spec,
            scratch_shapes=[pltpu.VMEM((dp, dp), jnp.float32),   # S = X^T X
                            pltpu.VMEM((1, dp), jnp.float32),    # column sums
                            pltpu.VMEM((1, 1), jnp.float32)],    # sum(x^2)
            compiler_params=pltpu.CompilerParams(
                dimension_semantics=("arbitrary",)),
        )(rw, x)
    return out[0, 0]


# ----------------------------------------------------------------------------
# Pure-JAX reference (mirrors the PyTorch module) for a sanity check.
# ----------------------------------------------------------------------------
def normal_reg_ref(x, reg_weight=1.0):
    n = x.shape[0]
    avg = jnp.mean(x, axis=0)
    mean_term = jnp.mean(avg ** 2)
    xm = x - avg
    covar = jnp.dot(xm.T, xm, precision=jax.lax.Precision.HIGHEST) / (n - 1)
    cov_loss = jnp.mean((jnp.eye(covar.shape[0], dtype=x.dtype) - covar) ** 2)
    return reg_weight * (mean_term + cov_loss)


# ----------------------------------------------------------------------------
if __name__ == "__main__":
    fwd = jax.jit(normal_reg)

    # Small path: latent-code batch (32, 128) — one VMEM tile, no padding.
    x_small = jax.random.normal(jax.random.PRNGKey(0), (32, 128), jnp.float32)
    loss_small = fwd(x_small, 1.0)
    jax.block_until_ready(loss_small)
    ref_small = normal_reg_ref(x_small, 1.0)
    assert loss_small.shape == ()
    assert np.isfinite(float(loss_small))
    np.testing.assert_allclose(float(loss_small), float(ref_small),
                               rtol=2e-2, atol=1e-3)

    # Tiled path: larger batch exercises the batch-reduction grid (grid = 4).
    x_big = jax.random.normal(jax.random.PRNGKey(1), (2048, 128), jnp.float32)
    loss_big = fwd(x_big, 0.5)
    jax.block_until_ready(loss_big)
    ref_big = normal_reg_ref(x_big, 0.5)
    assert np.isfinite(float(loss_big))
    np.testing.assert_allclose(float(loss_big), float(ref_big),
                               rtol=2e-2, atol=2e-4)

    print("KERNEL_OK")
</pallas_src>

<mosaic_0001>
module attributes {stable_mosaic.version = 11 : i64} {
  func.func @_normal_reg_small_kernel(%arg0: memref<1x1xf32, #tpu.memory_space<smem>>, %arg1: memref<32x128xf32, #tpu.memory_space<vmem>>, %arg2: memref<1x1xf32, #tpu.memory_space<smem>>) attributes {dimension_semantics = [], scalar_prefetch = 0 : i64, scratch_operands = 0 : i64, tpu.core_type = #tpu.core_type<tc>} {
    %c0 = arith.constant 0 : index
    %c0_0 = arith.constant 0 : index
    %0 = vector.load %arg1[%c0, %c0_0] : memref<32x128xf32, #tpu.memory_space<vmem>>, vector<32x128xf32>
    %cst = arith.constant dense<0.000000e+00> : vector<128xf32>
    %1 = vector.multi_reduction <add>, %0, %cst [0] : vector<32x128xf32> to vector<128xf32>
    %2 = vector.shape_cast %1 : vector<128xf32> to vector<1x128xf32>
    %cst_1 = arith.constant 3.125000e-02 : f32
    %3 = vector.broadcast %cst_1 : f32 to vector<1x128xf32>
    %4 = arith.mulf %2, %3 : vector<1x128xf32>
    %5 = arith.mulf %4, %4 : vector<1x128xf32>
    %6 = vector.shape_cast %5 : vector<1x128xf32> to vector<1x1x128xf32>
    %cst_2 = arith.constant dense<0.000000e+00> : vector<1xf32>
    %7 = vector.multi_reduction <add>, %6, %cst_2 [1, 2] : vector<1x1x128xf32> to vector<1xf32>
    %8 = vector.shape_cast %7 : vector<1xf32> to vector<1x1x1xf32>
    %9 = vector.extract %8[0, 0, 0] : f32 from vector<1x1x1xf32>
    %10 = vector.broadcast %9 : f32 to vector<1x1xf32>
    %cst_3 = arith.constant 7.812500e-03 : f32
    %11 = vector.broadcast %cst_3 : f32 to vector<1x1xf32>
    %12 = arith.mulf %10, %11 : vector<1x1xf32>
    %13 = vector.broadcast %4 : vector<1x128xf32> to vector<32x128xf32>
    %14 = arith.subf %0, %13 : vector<32x128xf32>
    %cst_4 = arith.constant 0.179605305 : f32
    %15 = vector.broadcast %cst_4 : f32 to vector<32x128xf32>
    %16 = arith.mulf %14, %15 : vector<32x128xf32>
    %cst_5 = arith.constant dense<0.000000e+00> : vector<128x128xf32>
    %17 = tpu.matmul %16, %16, %cst_5 {dimension_numbers = #tpu.dot_dimension_numbers<[0], [0], [1], [1], [0, 1, 1, 1], [], []>} : vector<32x128xf32>, vector<32x128xf32>, vector<128x128xf32> -> vector<128x128xf32>
    %18 = arith.mulf %16, %16 : vector<32x128xf32>
    %19 = vector.shape_cast %18 : vector<32x128xf32> to vector<1x32x128xf32>
    %cst_6 = arith.constant dense<0.000000e+00> : vector<1xf32>
    %20 = vector.multi_reduction <add>, %19, %cst_6 [1, 2] : vector<1x32x128xf32> to vector<1xf32>
    %21 = vector.shape_cast %20 : vector<1xf32> to vector<1x1x1xf32>
    %22 = vector.extract %21[0, 0, 0] : f32 from vector<1x1x1xf32>
    %23 = vector.broadcast %22 : f32 to vector<1x1xf32>
    %24 = arith.mulf %17, %17 : vector<128x128xf32>
    %25 = vector.shape_cast %24 : vector<128x128xf32> to vector<1x128x128xf32>
    %cst_7 = arith.constant dense<0.000000e+00> : vector<1xf32>
    %26 = vector.multi_reduction <add>, %25, %cst_7 [1, 2] : vector<1x128x128xf32> to vector<1xf32>
    %27 = vector.shape_cast %26 : vector<1xf32> to vector<1x1x1xf32>
    %28 = vector.extract %27[0, 0, 0] : f32 from vector<1x1x1xf32>
    %29 = vector.broadcast %28 : f32 to vector<1x1xf32>
    %cst_8 = arith.constant 2.000000e+00 : f32
    %30 = vector.broadcast %cst_8 : f32 to vector<1x1xf32>
    %31 = arith.mulf %30, %23 : vector<1x1xf32>
    %32 = arith.subf %29, %31 : vector<1x1xf32>
    %cst_9 = arith.constant 1.280000e+02 : f32
    %33 = vector.broadcast %cst_9 : f32 to vector<1x1xf32>
    %34 = arith.addf %32, %33 : vector<1x1xf32>
    %cst_10 = arith.constant 6.10351563E-5 : f32
    %35 = vector.broadcast %cst_10 : f32 to vector<1x1xf32>
    %36 = arith.mulf %34, %35 : vector<1x1xf32>
    %c0_11 = arith.constant 0 : index
    %c0_12 = arith.constant 0 : index
    %37 = memref.load %arg0[%c0_11, %c0_12] : memref<1x1xf32, #tpu.memory_space<smem>>
    %38 = arith.addf %12, %36 : vector<1x1xf32>
    %39 = vector.broadcast %37 : f32 to vector<1x1xf32>
    %40 = arith.mulf %39, %38 : vector<1x1xf32>
    %41 = vector.shape_cast %40 : vector<1x1xf32> to vector<1x1x1xf32>
    %cst_13 = arith.constant dense<0.000000e+00> : vector<1xf32>
    %42 = vector.multi_reduction <add>, %41, %cst_13 [1, 2] : vector<1x1x1xf32> to vector<1xf32>
    %43 = vector.shape_cast %42 : vector<1xf32> to vector<1x1x1xf32>
    %44 = vector.extract %43[0, 0, 0] : f32 from vector<1x1x1xf32>
    %c0_14 = arith.constant 0 : index
    %c0_15 = arith.constant 0 : index
    %45 = memref.load %arg2[%c0_14, %c0_15] : memref<1x1xf32, #tpu.memory_space<smem>>
    memref.store %44, %arg2[%c0_14, %c0_15] : memref<1x1xf32, #tpu.memory_space<smem>>
    return
  }
}

</mosaic_0001>

<bundles_post_ra>
// kernel: normal_reg.1
= control target key start
LH: loop header
LB: loop body
LE: loop exit
PB: predicated region body
PF: predicated region fallthrough
CT: control target
= control target key end

     0   :  { %8 = vsyncpa [#allocation4], 0  ;;  %s564_s0 = inlined_call_operand.<no memory space> [shape: f32[1,1], index: 0, kind: input, shape index: {}]   ;;  %s565_s1 = inlined_call_operand.hbm [shape: f32[32,128], index: 1, kind: input, shape index: {}]   ;;  %s566_s2 = inlined_call_operand.hbm [shape: f32[1,1], index: 2, kind: output, shape index: {}]  }
   0x1   :  { %9 = vsyncpa [#allocation5], 0  ;;  %s502_s9 = smov [#allocation3]   ;;  %s466_s13 = scalar_lea.hbm %s565_s1, 512 }
   0x2   :  { %s17_s10 = sshll.u32 %s502_s9, 4  ;;  %p467_p0 = scmp.ne.s32.totalorder %s565_s1, %s466_s13  ;;  %s18_s10 = int_to_ptr.vmem [resolvable:$true] %s17_s10 }
   0x3   :  { %p470_p1 = scmp.lt.u32.totalorder %s466_s13, %s565_s1 }
   0x5   :  { %p472_p2 = pnand %p470_p1, %p467_p0 }
   0x7   :  { %475 = shalt.err (!%p472_p2)
}
   0x8   :  { %s476_s18 = scalar_lea.vmem %s18_s10, 512  ;;  %p481_p4 = scmp.lt.s32.totalorder %s18_s10, %s18_s10 }
   0x9   :  { %p477_p3 = scmp.ne.s32.totalorder %s18_s10, %s476_s18  ;;  %p482_p5 = scmp.lt.s32.totalorder %s476_s18, %s476_s18 }
   0xb   :  { %p483_p6 = por %p482_p5, %p481_p4 }
   0xd   :  { %p484_p7 = pnand %p483_p6, %p477_p3 }
   0xf   :  { %487 = shalt.err (!%p484_p7)
}
  0x10   :  { %s503_s19 = smov 128   ;;  %s504_s20 = smov 8  }
  0x11   :  { %23 = dma.hbm_to_vmem [thread:$0]  %s565_s1, 512, %s18_s10, [#allocation4], %s503_s19, %s503_s19, %s504_s20  }
  0x12   :  { %498 = dma.done.wait [#allocation4], 512  }
  0x13   :  { %499 = vsyncadd [#allocation4], 4294966784  ;;  %v27_v0 = vld [vmem:[#allocation3] sm:$0xff]  ;;  %v28_v1 = vld [vmem:[#allocation3 + $0x8] sm:$0xff]  ;;  %vm95_vm0 = vcmask 261120   ;;  %vm42_vm1 = vcmask 1040384  }
  0x14   :  { %v29_v2 = vld [vmem:[#allocation3 + $0x10] sm:$0xff]  ;;  %v31_v3 = vadd.f32 %v28_v1, %v27_v0  ;;  %v30_v4 = vld [vmem:[#allocation3 + $0x18] sm:$0xff]  ;;  %s488_s30 = scalar_lea.hbm %s566_s2, 16 }
  0x15   :  { %p489_p8 = scmp.ne.s32.totalorder %s566_s2, %s488_s30  ;;  %p492_p9 = scmp.lt.u32.totalorder %s488_s30, %s566_s2 }
  0x16   :  { %v32_v5 = vadd.f32 %v31_v3, %v29_v2 }
  0x17   :  { %p494_p10 = pnand %p492_p9, %p489_p8 }
  0x18   :  { %v33_v6 = vadd.f32 %v32_v5, %v30_v4 }
  0x1a   :  { %v34_v7 = vrot.slane %v33_v6, 4 }
  0x1c   :  { %v35_v8 = vadd.f32 %v34_v7, %v33_v6 }
  0x1e   :  { %v36_v9 = vrot.slane %v35_v8, 2 }
  0x20   :  { %v37_v10 = vadd.f32 %v36_v9, %v35_v8 }
  0x22   :  { %v38_v11 = vrot.slane %v37_v10, 1 }
  0x24   :  { %v39_v12 = vadd.f32 %v38_v11, %v37_v10 }
  0x26   :  { %v40_v13 = vmul.f32 0.03125, %v39_v12 }
  0x28   :  { %v55_v14 = vsub.f32 %v27_v0, %v40_v13  ;;  %v56_v15 = vsub.f32 %v28_v1, %v40_v13  ;;  %v57_v16 = vsub.f32 %v29_v2, %v40_v13  ;;  %v58_v17 = vsub.f32 %v30_v4, %v40_v13 }
  0x29   :  { %v41_v42 = vmul.f32 %v40_v13, %v40_v13 }
  0x2a   :  { %v59_v18 = vmul.f32 0.1796053, %v55_v14  ;;  %v60_v19 = vmul.f32 0.1796053, %v56_v15  ;;  %v61_v20 = vmul.f32 0.1796053, %v57_v16 }
  0x2b   :  { %v62_v21 = vmul.f32 0.1796053, %v58_v17  ;;  %v43_v45 = vsel %vm42_vm1, %v41_v42, 0.0 }
  0x2c   :  { %63 = vxpose.xlu0.b32.start [1/4] (short) %v59_v18, 128  ;;  %v441_v22 = vpack.c.bf16 %v60_v19, %v59_v18  ;;  %v289_v40 = vmul.f32 %v59_v18, %v59_v18  ;;  %v290_v41 = vmul.f32 %v60_v19, %v60_v19  ;;  %v291_v43 = vmul.f32 %v61_v20, %v61_v20 }
  0x2d   :  { %v445_v23 = vpack.c.bf16 %v62_v21, %v61_v20  ;;  %44 = vadd.xlane.f32.xlu1 %v43_v45  ;;  %v292_v46 = vmul.f32 %v62_v21, %v62_v21 }
  0x2e   :  { %442 = vmatprep.subr.bf16.mxu0 %v441_v22  ;;  %449 = vmatprep.subr.bf16.mxu1 %v441_v22  ;;  %v293_v44 = vadd.f32 %v290_v41, %v289_v40 }
  0x2f   :  { %444 = vmatpush3.bf16.msra.mxu0 %v441_v22  ;;  %451 = vmatpush3.bf16.msra.mxu1 %v441_v22 }
  0x30   :  { %64 = vxpose.xlu0.b32.cont [2/4] (short) %v60_v19, 128  ;;  %446 = vmatprep.subr.bf16.mxu0 %v445_v23  ;;  %v294_v47 = vadd.f32 %v293_v44, %v291_v43 }
  0x31   :  { %450 = vmatprep.subr.bf16.mxu1 %v445_v23 }
  0x32   :  { %v295_v48 = vadd.f32 %v294_v47, %v292_v46 }
  0x33   :  { %448 = vmatpush3.bf16.msra.mxu0 %v445_v23  ;;  %452 = vmatpush3.bf16.msra.mxu1 %v445_v23 }
  0x34   :  { %65 = vxpose.xlu0.b32.cont [3/4] (short) %v61_v20, 128  ;;  %296 = vadd.xlane.f32.xlu1 %v295_v48 }
  0x38   :  { %66 = vxpose.xlu0.b32.end [4/4] (short) %v62_v21, 128 }
  0xac   :  { %v79_v24 = vpop.trf.xlu0 }
  0xad   :  { %417 = vmatprep.mubr.msk.f32.mxu0 %vm95_vm0, %v79_v24 }
  0xb0   :  { %v80_v25 = vpop.trf.xlu0 }
  0xb1   :  { %418 = vmatmul.mubr.msk.f32.vlgmr.msra.gmra.mrb[0].mxu0 %vm95_vm0, %v80_v25 }
  0xb4   :  { %v81_v26 = vpop.trf.xlu0 }
  0xb5   :  { %420 = vmatprep.mubr.msk.f32.mxu0 %vm95_vm0, %v81_v26 }
  0xb8   :  { %v82_v27 = vpop.trf.xlu0 }
  0xb9   :  { %421 = vmatmul.mubr.msk.f32.gmra.mrb[2].mxu0 %vm95_vm0, %v82_v27 }
  0xbc   :  { %v83_v28 = vpop.trf.xlu0 }
  0xbd   :  { %423 = vmatprep.mubr.msk.f32.mxu0 %vm95_vm0, %v83_v28 }
  0xc0   :  { %v84_v29 = vpop.trf.xlu0 }
  0xc1   :  { %424 = vmatmul.mubr.msk.f32.gmra.mrb[4].mxu0 %vm95_vm0, %v84_v29 }
  0xc4   :  { %v85_v30 = vpop.trf.xlu0 }
  0xc5   :  { %426 = vmatprep.mubr.msk.f32.mxu0 %vm95_vm0, %v85_v30 }
  0xc8   :  { %v86_v31 = vpop.trf.xlu0 }
  0xc9   :  { %427 = vmatmul.mubr.msk.f32.gmra.mrb[6].mxu0 %vm95_vm0, %v86_v31 }
  0xcc   :  { %v87_v32 = vpop.trf.xlu0 }
  0xcd   :  { %429 = vmatprep.mubr.msk.f32.mxu1 %vm95_vm0, %v87_v32  ;;  %v45_v32 = vpop.xlane.xlu1 %44 }
  0xd0   :  { %v88_v33 = vpop.trf.xlu0 }
  0xd1   :  { %430 = vmatmul.mubr.msk.f32.vlgmr.msra.gmra.mrb[0].mxu1 %vm95_vm0, %v88_v33  ;;  %v46_v33 = vrot.slane %v45_v32, 4 }
  0xd4   :  { %v89_v34 = vpop.trf.xlu0 }
  0xd5   :  { %432 = vmatprep.mubr.msk.f32.mxu1 %vm95_vm0, %v89_v34  ;;  %v47_v34 = vadd.f32 %v46_v33, %v45_v32 }
  0xd8   :  { %v90_v35 = vpop.trf.xlu0 }
  0xd9   :  { %433 = vmatmul.mubr.msk.f32.gmra.mrb[2].mxu1 %vm95_vm0, %v90_v35  ;;  %v297_v35 = vpop.xlane.xlu1 %296 }
  0xdc   :  { %v91_v36 = vpop.trf.xlu0 }
  0xdd   :  { %435 = vmatprep.mubr.msk.f32.mxu1 %vm95_vm0, %v91_v36  ;;  %v48_v36 = vrot.slane %v47_v34, 2 }
  0xe0   :  { %v92_v37 = vpop.trf.xlu0 }
  0xe1   :  { %436 = vmatmul.mubr.msk.f32.gmra.mrb[4].mxu1 %vm95_vm0, %v92_v37  ;;  %v298_v37 = vrot.slane %v297_v35, 4 }
  0xe4   :  { %v93_v38 = vpop.trf.xlu0 }
  0xe5   :  { %438 = vmatprep.mubr.msk.f32.mxu1 %vm95_vm0, %v93_v38  ;;  %v299_v38 = vadd.f32 %v298_v37, %v297_v35 }
  0xe7   :  { %v300_v40 = vrot.slane %v299_v38, 2 }
  0xe8   :  { %v94_v39 = vpop.trf.xlu0 }
  0xe9   :  { %439 = vmatmul.mubr.msk.f32.gmra.mrb[6].mxu1 %vm95_vm0, %v94_v39  ;;  %v49_v39 = vadd.f32 %v48_v36, %v47_v34  ;;  %v301_v43 = vadd.f32 %v300_v40, %v299_v38 }
  0xeb   :  { %v50_v41 = vrot.slane %v49_v39, 1  ;;  %v302_v44 = vrot.slane %v301_v43, 1 }
  0xed   :  { %v51_v42 = vadd.f32 %v50_v41, %v49_v39  ;;  %v303_v45 = vadd.f32 %v302_v44, %v301_v43 }
  0xef   :  { %453 = vpush %v51_v42 }
  0xf0   :  { %455 = vpush %v303_v45 }
 0x120   :  { %s454_s1 = spop %453 }
 0x121   :  { %s456_s23 = spop %455 }
 0x184   :  { %v419_v49 = vpop.f32.mrb[0].mxu0 }
 0x185   :  { %v307_v50 = vmul.f32 %v419_v49, %v419_v49  ;;  %v210_v51 = vpop.f32.mrb[1].mxu0 }
 0x186   :  { %v306_v52 = vmul.f32 %v210_v51, %v210_v51 }
 0x188   :  { %v322_v53 = vadd.f32 %v307_v50, %v306_v52 }
 0x18c   :  { %v422_v54 = vpop.f32.mrb[2].mxu0 }
 0x18d   :  { %v220_v55 = vpop.f32.mrb[3].mxu0  ;;  %v309_v57 = vmul.f32 %v422_v54, %v422_v54 }
 0x18e   :  { %v308_v56 = vmul.f32 %v220_v55, %v220_v55 }
 0x190   :  { %v323_v58 = vadd.f32 %v322_v53, %v308_v56  ;;  %v305_v53 = vstv %s456_s23 }
 0x191   :  { %v347_v54 = vmul.f32 2.0, %v305_v53 }
 0x192   :  { %v324_v59 = vadd.f32 %v323_v58, %v309_v57  ;;  %v53_v57 = vstv %s454_s1 }
 0x194   :  { %v425_v60 = vpop.f32.mrb[4].mxu0 }
 0x195   :  { %v230_v61 = vpop.f32.mrb[5].mxu0  ;;  %v311_v63 = vmul.f32 %v425_v60, %v425_v60 }
 0x196   :  { %v310_v62 = vmul.f32 %v230_v61, %v230_v61  ;;  %v353_v61 = vstv %s564_s0 }
 0x198   :  { %v325_v0 = vadd.f32 %v324_v59, %v310_v62  ;;  %v54_v59 = vmul.f32 0.0078125, %v53_v57 }
 0x19a   :  { %v326_v1 = vadd.f32 %v325_v0, %v311_v63 }
 0x19c   :  { %v428_v2 = vpop.f32.mrb[6].mxu0 }
 0x19d   :  { %v240_v3 = vpop.f32.mrb[7].mxu0  ;;  %v313_v5 = vmul.f32 %v428_v2, %v428_v2 }
 0x19e   :  { %v312_v4 = vmul.f32 %v240_v3, %v240_v3 }
 0x1a0   :  { %v327_v6 = vadd.f32 %v326_v1, %v312_v4 }
 0x1a2   :  { %v328_v7 = vadd.f32 %v327_v6, %v313_v5 }
 0x1a4   :  { %v431_v8 = vpop.f32.mrb[0].mxu1 }
 0x1a5   :  { %v250_v9 = vpop.f32.mrb[1].mxu1  ;;  %v315_v11 = vmul.f32 %v431_v8, %v431_v8 }
 0x1a6   :  { %v314_v10 = vmul.f32 %v250_v9, %v250_v9 }
 0x1a8   :  { %v329_v12 = vadd.f32 %v328_v7, %v314_v10 }
 0x1aa   :  { %v330_v13 = vadd.f32 %v329_v12, %v315_v11 }
 0x1ac   :  { %v434_v14 = vpop.f32.mrb[2].mxu1 }
 0x1ad   :  { %v260_v15 = vpop.f32.mrb[3].mxu1  ;;  %v317_v17 = vmul.f32 %v434_v14, %v434_v14 }
 0x1ae   :  { %v316_v16 = vmul.f32 %v260_v15, %v260_v15 }
 0x1b0   :  { %v331_v18 = vadd.f32 %v330_v13, %v316_v16 }
 0x1b2   :  { %v332_v19 = vadd.f32 %v331_v18, %v317_v17 }
 0x1b4   :  { %v437_v20 = vpop.f32.mrb[4].mxu1 }
 0x1b5   :  { %v270_v21 = vpop.f32.mrb[5].mxu1  ;;  %v319_v23 = vmul.f32 %v437_v20, %v437_v20 }
 0x1b6   :  { %v318_v22 = vmul.f32 %v270_v21, %v270_v21 }
 0x1b8   :  { %v333_v24 = vadd.f32 %v332_v19, %v318_v22 }
 0x1ba   :  { %v334_v25 = vadd.f32 %v333_v24, %v319_v23 }
 0x1bc   :  { %v440_v26 = vpop.f32.mrb[6].mxu1 }
 0x1bd   :  { %v280_v27 = vpop.f32.mrb[7].mxu1  ;;  %v321_v29 = vmul.f32 %v440_v26, %v440_v26 }
 0x1be   :  { %v320_v28 = vmul.f32 %v280_v27, %v280_v27 }
 0x1c0   :  { %v335_v30 = vadd.f32 %v334_v25, %v320_v28 }
 0x1c2   :  { %v336_v31 = vadd.f32 %v335_v30, %v321_v29 }
 0x1c4   :  { %337 = vadd.xlane.f32.xlu1 %v336_v31 }
 0x251   :  { %v338_v46 = vpop.xlane.xlu1 %337 }
 0x252   :  { %v339_v47 = vrot.slane %v338_v46, 4 }
 0x254   :  { %v340_v48 = vadd.f32 %v339_v47, %v338_v46 }
 0x256   :  { %v341_v49 = vrot.slane %v340_v48, 2 }
 0x258   :  { %v342_v50 = vadd.f32 %v341_v49, %v340_v48 }
 0x25a   :  { %v343_v51 = vrot.slane %v342_v50, 1 }
 0x25c   :  { %v344_v52 = vadd.f32 %v343_v51, %v342_v50 }
 0x25e   :  { %457 = vpush %v344_v52 }
 0x28f   :  { %s458_s24 = spop %457 }
 0x290   :  { %v346_v55 = vstv %s458_s24 }
 0x291   :  { %v348_v56 = vsub.f32 %v346_v55, %v347_v54 }
 0x293   :  { %v349_v58 = vadd.f32 128.0, %v348_v56 }
 0x295   :  { %v350_v60 = vmul.f32 6.1035156e-05, %v349_v58 }
 0x297   :  { %v352_v62 = vadd.f32 %v350_v60, %v54_v59 }
 0x299   :  { %v354_v63 = vmul.f32 %v353_v61, %v352_v62 }
 0x29b   :  { %459 = vpush %v354_v63 }
 0x2cc   :  { %s460_s27 = spop %459 }
 0x2cd   :  { %358 = sst [smem:[#allocation6]] %s460_s27 }
 0x2ce   :  { %497 = shalt.err (!%p494_p10)
}
 0x2cf   :  { %s505_s0 = smov [#allocation6]  }
 0x2d0   :  { %366 = dma.smem_to_hbm %s505_s0, 16, %s566_s2, [#allocation5]  }
 0x2d1   :  { %500 = dma.done.wait [#allocation5], 16  }
 0x2d2   :  { %501 = vsyncadd [#allocation5], 4294967280 }
 0x2d3   :  { %370 = sfence }
 0x2d4   :  { %371 = vsyncpa [#allocation4], 1 }
 0x2d5   :  { %372 = vsyncpa [#allocation5], 1 }

</bundles_post_ra>
